<compile_context>
chip_gen: v7x
topology: tpu7x:2x2x1
jax: 0.10.0
libtpu: 0.0.40
codegen_flags: <defaults>
</compile_context>

<pallas_src>
import jax
import jax.numpy as jnp
from jax import lax
from jax.experimental import pallas as pl
from jax.experimental.pallas import tpu as pltpu


def _pipeline_kernel(feats_ref, w_ref, coll_ref, query_ref, out_ref):
    """Fused: score (VPU) -> first-argmax -> one-hot gather -> fewshot matmul."""
    feats = feats_ref[...]            # (Q, N, D)
    coll = coll_ref[...]              # (Q, N, D)
    w = w_ref[...]                    # (1, D), lane-dense scorer weight

    # network.compute_logits(...)['end']: per-object scores.
    # VPU multiply + lane reduce; keeps the MXU free and avoids a
    # lane-width-1 matvec result.
    scores = jnp.sum(feats * w, axis=-1)                       # (Q, N) f32

    # end.squeeze(0).max(0).indices : FIRST index achieving the max.
    # Exact f32 equality is safe here (same values compared in-kernel);
    # "first index" matches jnp.argmax / torch.max(0).indices tie-breaking.
    q_dim, n_dim = scores.shape
    iota = lax.broadcasted_iota(jnp.int32, (q_dim, n_dim), 1)  # (Q, N)
    max_val = jnp.max(scores, axis=1, keepdims=True)           # (Q, 1)
    idx = jnp.min(jnp.where(scores == max_val, iota, n_dim),
                  axis=1, keepdims=True)                       # (Q, 1)

    # shots[q] = object_collections[q, idx[q]] via one-hot weighted reduce
    # (TPU-friendly dynamic gather, all Q rows in one shot, stays on VPU/XLU).
    onehot = (iota == idx).astype(coll.dtype)                  # (Q, N)
    shots = jnp.sum(onehot[:, :, None] * coll, axis=1)         # (Q, D)

    # fewshot(self): entailment logits query x shots. Contract on the last
    # dims directly -- no explicit .T / vxpose relayout before the MXU push.
    out_ref[...] = lax.dot_general(
        query_ref[...], shots,
        dimension_numbers=(((1,), (1,)), ((), ())),
        preferred_element_type=jnp.float32)                    # (M, Q)


def pipeline_learner_forward(train_feats, object_collections, query_feats,
                             w_score, *, is_fewshot=True):
    Q, N, D = train_feats.shape
    M = query_feats.shape[0]

    if not is_fewshot:
        # shots = shots[0:0]: zero-shot program over an empty support set.
        # Early return BEFORE any kernel is traced/launched.
        # TODO(synk): downstream fewshot program with 0 shots has no in-kernel
        # compute; the degenerate empty-logit tensor is produced in glue.
        return jnp.zeros((M, 0), jnp.float32)

    w_row = w_score.reshape(1, D)   # lane-dense (1, D) weight layout

    # Single fused pallas_call, one grid step. All block shapes equal the full
    # array dims, so the (8, 128) tiling constraint does not apply here.
    # NOTE: output last dim is Q (=2 here) -> masked stores; acceptable at this
    # size, pad/tile Q (or emit (Q, M) and transpose in glue) for realistic Q.
    logits = pl.pallas_call(
        _pipeline_kernel,
        out_shape=jax.ShapeDtypeStruct((M, Q), jnp.float32),
        grid=(1,),
        in_specs=[
            pl.BlockSpec((Q, N, D), lambda i: (0, 0, 0)),   # train_feats
            pl.BlockSpec((1, D), lambda i: (0, 0)),          # scorer weight
            pl.BlockSpec((Q, N, D), lambda i: (0, 0, 0)),   # object_collections
            pl.BlockSpec((M, D), lambda i: (0, 0)),          # query_feats
        ],
        out_specs=pl.BlockSpec((M, Q), lambda i: (0, 0)),
        compiler_params=pltpu.CompilerParams(
            dimension_semantics=("arbitrary",),
            vmem_limit_bytes=64 << 20),
    )(train_feats, w_row, object_collections, query_feats)
    return logits


def _reference(train_feats, object_collections, query_feats, w_score):
    end = jnp.einsum("qnd,dk->qnk", train_feats, w_score)[..., 0]   # (Q, N)
    idx = jnp.argmax(end, axis=1)                                    # (Q,)
    shots = jnp.take_along_axis(
        object_collections, idx[:, None, None], axis=1)[:, 0, :]    # (Q, D)
    return query_feats @ shots.T                                     # (M, Q)


if __name__ == "__main__":
    Q, N, D, M = 2, 8, 32, 8   # 2 train sub-programs, 8 objects each, 32-d feats

    key = jax.random.PRNGKey(0)
    k1, k2, k3, k4 = jax.random.split(key, 4)
    train_feats = jax.random.normal(k1, (Q, N, D), dtype=jnp.float32)
    object_collections = jax.random.normal(k2, (Q, N, D), dtype=jnp.float32)
    query_feats = jax.random.normal(k3, (M, D), dtype=jnp.float32)
    # deterministic synthetic "network" scorer parameters
    w_score = jax.random.normal(k4, (D, 1), dtype=jnp.float32) * 0.1

    out = pipeline_learner_forward(
        train_feats, object_collections, query_feats, w_score, is_fewshot=True)
    out = jax.block_until_ready(out)

    ref = _reference(train_feats, object_collections, query_feats, w_score)
    assert out.shape == (M, Q)
    assert jnp.allclose(out, ref, atol=1e-4, rtol=1e-4), "mismatch vs reference"

    # zero-shot path: no kernel launch, empty logits
    zs = pipeline_learner_forward(
        train_feats, object_collections, query_feats, w_score, is_fewshot=False)
    assert zs.shape == (M, 0)

    print("KERNEL_OK")
</pallas_src>

<mosaic_0001>
module attributes {stable_mosaic.version = 11 : i64} {
  func.func @_pipeline_kernel(%arg0: i32, %arg1: memref<2x8x32xf32, #tpu.memory_space<vmem>>, %arg2: memref<1x32xf32, #tpu.memory_space<vmem>>, %arg3: memref<2x8x32xf32, #tpu.memory_space<vmem>>, %arg4: memref<8x32xf32, #tpu.memory_space<vmem>>, %arg5: memref<8x2xf32, #tpu.memory_space<vmem>>) attributes {dimension_semantics = [#tpu.dimension_semantics<arbitrary>], iteration_bounds = array<i64: 1>, scalar_prefetch = 0 : i64, scratch_operands = 0 : i64, tpu.core_type = #tpu.core_type<tc>, window_params = [{pipeline_mode = #tpu.pipeline_mode<synchronous>, transform_indices = @transform_0, window_bounds = array<i64: 2, 8, 32>}, {pipeline_mode = #tpu.pipeline_mode<synchronous>, transform_indices = @transform_1, window_bounds = array<i64: 1, 32>}, {pipeline_mode = #tpu.pipeline_mode<synchronous>, transform_indices = @transform_2, window_bounds = array<i64: 2, 8, 32>}, {pipeline_mode = #tpu.pipeline_mode<synchronous>, transform_indices = @transform_3, window_bounds = array<i64: 8, 32>}, {pipeline_mode = #tpu.pipeline_mode<synchronous>, transform_indices = @transform_4, window_bounds = array<i64: 8, 2>}]} {
    %c0 = arith.constant 0 : index
    %c0_0 = arith.constant 0 : index
    %c0_1 = arith.constant 0 : index
    %0 = vector.load %arg1[%c0, %c0_0, %c0_1] : memref<2x8x32xf32, #tpu.memory_space<vmem>>, vector<2x8x32xf32>
    %c0_2 = arith.constant 0 : index
    %c0_3 = arith.constant 0 : index
    %c0_4 = arith.constant 0 : index
    %1 = vector.load %arg3[%c0_2, %c0_3, %c0_4] : memref<2x8x32xf32, #tpu.memory_space<vmem>>, vector<2x8x32xf32>
    %c0_5 = arith.constant 0 : index
    %c0_6 = arith.constant 0 : index
    %2 = vector.load %arg2[%c0_5, %c0_6] : memref<1x32xf32, #tpu.memory_space<vmem>>, vector<1x32xf32>
    %3 = vector.shape_cast %2 : vector<1x32xf32> to vector<1x1x32xf32>
    %4 = vector.broadcast %3 : vector<1x1x32xf32> to vector<2x8x32xf32>
    %5 = arith.mulf %0, %4 : vector<2x8x32xf32>
    %cst = arith.constant dense<0.000000e+00> : vector<2x8xf32>
    %6 = vector.multi_reduction <add>, %5, %cst [2] : vector<2x8x32xf32> to vector<2x8xf32>
    %7 = tpu.iota {dimensions = array<i32: 1>} : vector<2x8xi32>
    %cst_7 = arith.constant dense<0xFF800000> : vector<2xf32>
    %8 = vector.multi_reduction <maximumf>, %6, %cst_7 [1] : vector<2x8xf32> to vector<2xf32>
    %9 = vector.shape_cast %8 : vector<2xf32> to vector<2x1xf32>
    %10 = vector.broadcast %9 : vector<2x1xf32> to vector<2x8xf32>
    %11 = arith.cmpf oeq, %6, %10 : vector<2x8xf32>
    %c8_i32 = arith.constant 8 : i32
    %12 = vector.broadcast %c8_i32 : i32 to vector<2x8xi32>
    %13 = arith.select %11, %7, %12 : vector<2x8xi1>, vector<2x8xi32>
    %cst_8 = arith.constant dense<2147483647> : vector<2xi32>
    %14 = vector.multi_reduction <minsi>, %13, %cst_8 [1] : vector<2x8xi32> to vector<2xi32>
    %15 = vector.shape_cast %14 : vector<2xi32> to vector<2x1xi32>
    %16 = vector.broadcast %15 : vector<2x1xi32> to vector<2x8xi32>
    %17 = arith.cmpi eq, %7, %16 : vector<2x8xi32>
    %18 = arith.extui %17 : vector<2x8xi1> to vector<2x8xi32>
    %19 = arith.sitofp %18 : vector<2x8xi32> to vector<2x8xf32>
    %20 = vector.shape_cast %19 : vector<2x8xf32> to vector<2x8x1xf32>
    %21 = vector.broadcast %20 : vector<2x8x1xf32> to vector<2x8x32xf32>
    %22 = arith.mulf %21, %1 : vector<2x8x32xf32>
    %cst_9 = arith.constant dense<0.000000e+00> : vector<2x32xf32>
    %23 = vector.multi_reduction <add>, %22, %cst_9 [1] : vector<2x8x32xf32> to vector<2x32xf32>
    %c0_10 = arith.constant 0 : index
    %c0_11 = arith.constant 0 : index
    %24 = vector.load %arg4[%c0_10, %c0_11] : memref<8x32xf32, #tpu.memory_space<vmem>>, vector<8x32xf32>
    %cst_12 = arith.constant dense<0.000000e+00> : vector<8x2xf32>
    %25 = tpu.matmul %24, %23, %cst_12 {dimension_numbers = #tpu.dot_dimension_numbers<[1], [1], [0], [0], [0, 0, 1, 0], [], []>} : vector<8x32xf32>, vector<2x32xf32>, vector<8x2xf32> -> vector<8x2xf32>
    %c0_13 = arith.constant 0 : index
    %c0_14 = arith.constant 0 : index
    %26 = vector.load %arg5[%c0_13, %c0_14] : memref<8x2xf32, #tpu.memory_space<vmem>>, vector<8x2xf32>
    tpu.vector_store %arg5[%c0_13, %c0_14], %25 {strides = array<i32>} : memref<8x2xf32, #tpu.memory_space<vmem>>, vector<8x2xf32>,
    return
  }
  func.func @transform_0(%arg0: i32) -> (i32, i32, i32) {
    %c0_i32 = arith.constant 0 : i32
    %c0_i32_0 = arith.constant 0 : i32
    %c0_i32_1 = arith.constant 0 : i32
    %c0_i32_2 = arith.constant 0 : i32
    return %c0_i32, %c0_i32_0, %c0_i32_1 : i32, i32, i32
  }
  func.func @transform_1(%arg0: i32) -> (i32, i32) {
    %c0_i32 = arith.constant 0 : i32
    %c0_i32_0 = arith.constant 0 : i32
    %c0_i32_1 = arith.constant 0 : i32
    return %c0_i32, %c0_i32_0 : i32, i32
  }
  func.func @transform_2(%arg0: i32) -> (i32, i32, i32) {
    %c0_i32 = arith.constant 0 : i32
    %c0_i32_0 = arith.constant 0 : i32
    %c0_i32_1 = arith.constant 0 : i32
    %c0_i32_2 = arith.constant 0 : i32
    return %c0_i32, %c0_i32_0, %c0_i32_1 : i32, i32, i32
  }
  func.func @transform_3(%arg0: i32) -> (i32, i32) {
    %c0_i32 = arith.constant 0 : i32
    %c0_i32_0 = arith.constant 0 : i32
    %c0_i32_1 = arith.constant 0 : i32
    return %c0_i32, %c0_i32_0 : i32, i32
  }
  func.func @transform_4(%arg0: i32) -> (i32, i32) {
    %c0_i32 = arith.constant 0 : i32
    %c0_i32_0 = arith.constant 0 : i32
    %c0_i32_1 = arith.constant 0 : i32
    return %c0_i32, %c0_i32_0 : i32, i32
  }
}

</mosaic_0001>

<bundles_post_ra>
// kernel: tpu_custom_call.1
= control target key start
LH: loop header
LB: loop body
LE: loop exit
PB: predicated region body
PF: predicated region fallthrough
CT: control target
= control target key end

     0   :  { %9 = vsyncpa [#allocation3], 0  ;;  %s541_s0 = inlined_call_operand.hbm [shape: f32[2,8,32], index: 0, kind: input, shape index: {}]   ;;  %s542_s1 = inlined_call_operand.hbm [shape: f32[1,32], index: 1, kind: input, shape index: {}]   ;;  %s543_s2 = inlined_call_operand.hbm [shape: f32[2,8,32], index: 2, kind: input, shape index: {}]   ;;  %s544_s3 = inlined_call_operand.hbm [shape: f32[8,32], index: 3, kind: input, shape index: {}]   ;;  %s545_s4 = inlined_call_operand.hbm [shape: f32[8,2], index: 4, kind: output, shape index: {}]  }
   0x1   :  { %10 = vsyncpa [#allocation6], 0 }
   0x2   :  { %11 = vsyncpa [#allocation9], 0 }
   0x3   :  { %12 = vsyncpa [#allocation4], 0  ;;  %s428_s15 = smov [#allocation5]   ;;  %s429_s17 = smov [#allocation2]  }
   0x4   :  { %s31_s16 = sshll.u32 %s428_s15, 4  ;;  %s18_s18 = sshll.u32 %s429_s17, 4  ;;  %s32_s16 = int_to_ptr.vmem [resolvable:$true] %s31_s16  ;;  %s463_s18 = int_to_ptr.vmem [resolvable:$true] %s18_s18 }
   0x5   :  { %s310_s21 = scalar_lea.hbm %s542_s1, 16 }
   0x6   :  { %p311_p0 = scmp.ne.s32.totalorder %s542_s1, %s310_s21  ;;  %p314_p1 = scmp.lt.u32.totalorder %s310_s21, %s542_s1 }
   0x8   :  { %p316_p2 = pnand %p314_p1, %p311_p0 }
   0xa   :  { %319 = shalt.err (!%p316_p2)
}
   0xb   :  { %s320_s26 = scalar_lea.vmem %s32_s16, 16  ;;  %s324_s27 = scalar_lea.vmem %s32_s16, 32 }
   0xc   :  { %p321_p3 = scmp.ne.s32.totalorder %s32_s16, %s320_s26  ;;  %p325_p4 = scmp.lt.s32.totalorder %s32_s16, %s32_s16 }
   0xd   :  { %p326_p5 = scmp.lt.s32.totalorder %s324_s27, %s320_s26 }
   0xf   :  { %p327_p6 = por %p326_p5, %p325_p4 }
  0x11   :  { %p328_p7 = pnand %p327_p6, %p321_p3 }
  0x13   :  { %331 = shalt.err (!%p328_p7)
}
  0x14   :  { %34 = dma.hbm_to_vmem [thread:$0]  %s542_s1, 16, %s32_s16, [#allocation6]  }
  0x15   :  { %s332_s6 = scalar_lea.hbm %s541_s0, 256 }
  0x16   :  { %p333_p8 = scmp.ne.s32.totalorder %s541_s0, %s332_s6  ;;  %p336_p9 = scmp.lt.u32.totalorder %s332_s6, %s541_s0 }
  0x18   :  { %p338_p10 = pnand %p336_p9, %p333_p8 }
  0x1a   :  { %341 = shalt.err (!%p338_p10)
}
  0x1b   :  { %s342_s11 = scalar_lea.vmem %s463_s18, 256  ;;  %p347_p12 = scmp.lt.s32.totalorder %s463_s18, %s463_s18 }
  0x1c   :  { %p343_p11 = scmp.ne.s32.totalorder %s463_s18, %s342_s11  ;;  %p348_p13 = scmp.lt.s32.totalorder %s342_s11, %s342_s11 }
  0x1e   :  { %p349_p0 = por %p348_p13, %p347_p12 }
  0x20   :  { %p350_p1 = pnand %p349_p0, %p343_p11 }
  0x22   :  { %353 = shalt.err (!%p350_p1)
}
  0x23   :  { %s430_s1 = smov 128   ;;  %s431_s12 = smov 8  }
  0x24   :  { %24 = dma.hbm_to_vmem [thread:$0]  %s541_s0, 256, %s463_s18, [#allocation3], %s430_s1, %s430_s1, %s431_s12  }
  0x25   :  { %s432_s15 = smov [#allocation7]   ;;  %s433_s17 = smov [#allocation8]  }
  0x26   :  { %s40_s16 = sshll.u32 %s432_s15, 4  ;;  %s53_s19 = sshll.u32 %s433_s17, 4  ;;  %s41_s16 = int_to_ptr.vmem [resolvable:$true] %s40_s16  ;;  %s54_s19 = int_to_ptr.vmem [resolvable:$true] %s53_s19 }
  0x27   :  { %s354_s22 = scalar_lea.hbm %s543_s2, 256 }
  0x28   :  { %p355_p2 = scmp.ne.s32.totalorder %s543_s2, %s354_s22  ;;  %p358_p3 = scmp.lt.u32.totalorder %s354_s22, %s543_s2 }
  0x2a   :  { %p360_p4 = pnand %p358_p3, %p355_p2 }
  0x2c   :  { %363 = shalt.err (!%p360_p4)
}
  0x2d   :  { %s364_s0 = scalar_lea.vmem %s41_s16, 256  ;;  %p369_p6 = scmp.lt.s32.totalorder %s41_s16, %s41_s16 }
  0x2e   :  { %p365_p5 = scmp.ne.s32.totalorder %s41_s16, %s364_s0  ;;  %p370_p7 = scmp.lt.s32.totalorder %s364_s0, %s364_s0 }
  0x30   :  { %p371_p8 = por %p370_p7, %p369_p6 }
  0x32   :  { %p372_p9 = pnand %p371_p8, %p365_p5 }
  0x34   :  { %375 = shalt.err (!%p372_p9)
}
  0x35   :  { %46 = dma.hbm_to_vmem [thread:$0]  %s543_s2, 256, %s41_s16, [#allocation6], %s430_s1, %s430_s1, %s431_s12  }
  0x36   :  { %s376_s30 = scalar_lea.hbm %s544_s3, 128 }
  0x37   :  { %p377_p10 = scmp.ne.s32.totalorder %s544_s3, %s376_s30  ;;  %p380_p11 = scmp.lt.u32.totalorder %s376_s30, %s544_s3 }
  0x39   :  { %p382_p12 = pnand %p380_p11, %p377_p10 }
  0x3b   :  { %385 = shalt.err (!%p382_p12)
}
  0x3c   :  { %s386_s9 = scalar_lea.vmem %s54_s19, 128  ;;  %p391_p0 = scmp.lt.s32.totalorder %s54_s19, %s54_s19 }
  0x3d   :  { %p387_p13 = scmp.ne.s32.totalorder %s54_s19, %s386_s9  ;;  %p392_p1 = scmp.lt.s32.totalorder %s386_s9, %s386_s9 }
  0x3f   :  { %p393_p2 = por %p392_p1, %p391_p0 }
  0x41   :  { %p394_p3 = pnand %p393_p2, %p387_p13 }
  0x43   :  { %397 = shalt.err (!%p394_p3)
}
  0x44   :  { %56 = dma.hbm_to_vmem [thread:$0]  %s544_s3, 128, %s54_s19, [#allocation9]  }
  0x45   :  { %420 = dma.done.wait [#allocation3], 256  }
  0x46   :  { %421 = vsyncadd [#allocation3], 4294967040 }
  0x47   :  { %422 = dma.done.wait [#allocation6], 272  }
  0x48   :  { %423 = vsyncadd [#allocation6], 4294967024 }
  0x49   :  { %424 = dma.done.wait [#allocation9], 128  }
  0x4a   :  { %425 = vsyncadd [#allocation9], 4294967168  ;;  %v69_v0 = vld [vmem:[#allocation2] sm:$0xff]  ;;  %v287_v1 = vld [vmem:[#allocation5] ss:$0 sm:$0xff]  ;;  %vm82_vm0 = vcmask 261120   ;;  %v89_v7 = vlaneseq }
  0x4b   :  { %v70_v2 = vld [vmem:[#allocation2 + $0x8] sm:$0xff]  ;;  %v80_v3 = vmul.f32 %v287_v1, %v69_v0  ;;  %vm101_vm1 = vcmask 1041409   ;;  %vm104_vm2 = vcmask 58368   ;;  %v434_v17 = vmov 0   ;;  %v71_v47 = vld [vmem:[#allocation7] sm:$0xff]  ;;  %v72_v50 = vld [vmem:[#allocation7 + $0x8] sm:$0xff] }
  0x4c   :  { %v81_v4 = vmul.f32 %v287_v1, %v70_v2  ;;  %v90_v8 = vand.u32 127, %v89_v7  ;;  %v94_v9 = vshrl.u32 %v89_v7, 7  ;;  %309 = vset.pattern.permute.xlu1 %v434_v17  ;;  %308 = vset.pattern.permute.xlu0 %v434_v17  ;;  %v435_v38 = vmov 0.0   ;;  %s437_s3 = smov [#allocation10]  }
  0x4d   :  { %v83_v5 = vsel %vm82_vm0, %v80_v3, 0.0  ;;  %293 = vmatprep.subr.mxu0 %v435_v38  ;;  %vm436_vm7 = vmmov 0   ;;  %s276_s11 = sshll.u32 %s437_s3, 4  ;;  %vm268_vm8 = vcmask 15360   ;;  %s277_s11 = int_to_ptr.vmem [resolvable:$true] %s276_s11 }
  0x4e   :  { %84 = vadd.xlane.f32.xlu0 %v83_v5  ;;  %v86_v6 = vsel %vm82_vm0, %v81_v4, 0.0  ;;  %v95_v11 = vsub.s32 %v90_v8, %v94_v9  ;;  %v111_v18 = vsub.s32 0, %v94_v9  ;;  %v115_v19 = vsub.s32 1, %v94_v9  ;;  %295 = vmatprep.mubr.msk.f32.mxu0 %vm436_vm7, %v435_v38  ;;  %v189_v4 = vld [vmem:[#allocation8] sm:$0xff]  ;;  %s398_s1 = scalar_lea.vmem %s277_s11, 128  ;;  %p403_p5 = scmp.lt.s32.totalorder %s277_s11, %s277_s11 }
  0x4f   :  { %p399_p4 = scmp.ne.s32.totalorder %s277_s11, %s398_s1  ;;  %p404_p6 = scmp.lt.s32.totalorder %s398_s1, %s398_s1 }
  0x51   :  { %p405_p7 = por %p404_p6, %p403_p5 }
  0x52   :  { %87 = vadd.xlane.f32.xlu0 %v86_v6 }
  0x53   :  { %p406_p8 = pnand %p405_p7, %p399_p4 }
  0xdb   :  { %v85_v10 = vpop.xlane.xlu0 %84 }
  0xdc   :  { %v96_v13 = vrot.slane %v85_v10, %v95_v11 }
  0xdf   :  { %v88_v12 = vpop.xlane.xlu0 %87 }
  0xe0   :  { %v100_v14 = vrot.slane %v88_v12, %v95_v11 }
  0xe2   :  { %v102_v15 = vsel %vm101_vm1, %v100_v14, %v96_v13 }
  0xe3   :  { %v105_v16 = vsel %vm104_vm2, %v102_v15, -inf }
  0xe4   :  { %106 = vmax.xlane.f32.xlu1 %v105_v16 }
  0xf5   :  { %122 = vbcast.lane.b32.xlu1 %v90_v8, 256 }
 0x171   :  { %v107_v20 = vpop.xlane.xlu1 %106 }
 0x172   :  { %v112_v21 = vrot.slane %v107_v20, %v111_v18  ;;  %v116_v22 = vrot.slane %v107_v20, %v115_v19 }
 0x174   :  { %vm120_vm3 = vcmp.eq.f32.partialorder %v88_v12, %v116_v22  ;;  %vm119_vm4 = vcmp.eq.f32.partialorder %v85_v10, %v112_v21 }
 0x175   :  { %v123_v23 = vpop.permute.xlu1 %122 }
 0x176   :  { %v125_v24 = vsel %vm120_vm3, %v123_v23, 8  ;;  %v124_v25 = vsel %vm119_vm4, %v123_v23, 8 }
 0x177   :  { %130 = vperm.xlu1 %309, %v125_v24   ;;  %127 = vperm.xlu0 %308, %v124_v25  }
 0x1f6   :  { %v131_v26 = vpop.permute.xlu1 %130  ;;  %v128_v27 = vpop.permute.xlu0 %127 }
 0x1f7   :  { %v139_v28 = vrot.slane %v131_v26, %v95_v11  ;;  %v135_v29 = vrot.slane %v128_v27, %v95_v11 }
 0x1f9   :  { %v140_v30 = vsel %vm101_vm1, %v139_v28, %v135_v29 }
 0x1fa   :  { %v141_v31 = vsel %vm104_vm2, %v140_v30, 2147483647 }
 0x1fb   :  { %v143_v32 = vshra.s32 %v141_v31, 16  ;;  %v142_v34 = vand.u32 65535, %v141_v31 }
 0x1fd   :  { %v145_v33 = vcvt.s32.f32 %v143_v32  ;;  %v144_v36 = vcvt.s32.f32 %v142_v34 }
 0x1ff   :  { %146 = vmin.xlane.f32.xlu1 %v145_v33 }
 0x28c   :  { %v147_v35 = vpop.xlane.xlu1 %146 }
 0x28d   :  { %vm148_vm5 = vcmp.eq.f32.partialorder %v145_v33, %v147_v35  ;;  %v153_v39 = vcvt.f32.s32 %v147_v35 }
 0x28e   :  { %v149_v37 = vsel %vm148_vm5, %v144_v36, inf }
 0x28f   :  { %150 = vmin.xlane.f32.xlu0 %v149_v37  ;;  %v154_v41 = vshll.u32 %v153_v39, 16 }
 0x31c   :  { %v151_v40 = vpop.xlane.xlu0 %150 }
 0x31d   :  { %v152_v42 = vcvt.f32.s32 %v151_v40 }
 0x31f   :  { %v155_v43 = vadd.s32 %v154_v41, %v152_v42 }
 0x321   :  { %vm156_vm6 = vcmp.eq.s32.totalorder %v90_v8, %v155_v43 }
 0x322   :  { %v288_v44 = vsel %vm156_vm6, 1.0, %v435_v38 }
 0x323   :  { %v162_v45 = vrot.slane %v288_v44, %v111_v18  ;;  %v169_v46 = vrot.slane %v288_v44, %v115_v19 }
 0x325   :  { %164 = vbcast.lane.b32.xlu1 %v162_v45, 256 }
 0x329   :  { %171 = vbcast.lane.b32.xlu1 %v169_v46, 256 }
 0x397   :  { %v165_v48 = vpop.permute.xlu1 %164 }
 0x398   :  { %v173_v49 = vmul.f32 %v165_v48, %v71_v47 }
 0x39a   :  { %v175_v51 = vsel %vm82_vm0, %v173_v49, 0.0 }
 0x39b   :  { %v176_v52 = vrot.slane %v175_v51, 4  ;;  %v172_v53 = vpop.permute.xlu1 %171 }
 0x39c   :  { %v174_v54 = vmul.f32 %v172_v53, %v72_v50 }
 0x39d   :  { %v177_v55 = vadd.f32 %v176_v52, %v175_v51 }
 0x39e   :  { %v182_v56 = vsel %vm82_vm0, %v174_v54, 0.0 }
 0x39f   :  { %v178_v57 = vrot.slane %v177_v55, 2  ;;  %v183_v58 = vrot.slane %v182_v56, 4 }
 0x3a1   :  { %v179_v59 = vadd.f32 %v178_v57, %v177_v55  ;;  %v184_v60 = vadd.f32 %v183_v58, %v182_v56 }
 0x3a3   :  { %v185_v61 = vrot.slane %v184_v60, 2  ;;  %v180_v62 = vrot.slane %v179_v59, 1 }
 0x3a5   :  { %v186_v63 = vadd.f32 %v185_v61, %v184_v60  ;;  %v181_v1 = vadd.f32 %v180_v62, %v179_v59 }
 0x3a7   :  { %v187_v0 = vrot.slane %v186_v63, 1 }
 0x3a9   :  { %v188_v2 = vadd.f32 %v187_v0, %v186_v63 }
 0x3ab   :  { %v192_v3 = vsel %vm101_vm1, %v188_v2, %v181_v1 }
 0x3ac   :  { %294 = vmatpush3.xpose.msk.msra.mxu0 %vm82_vm0, %v192_v3 }
 0x3af   :  { %296 = vmatmul.mubr.msk.f32.vlgmr.msra.gmra.mrb[0].mxu0 %vm82_vm0, %v189_v4 }
 0x482   :  { %v264_v5 = vpop.f32.mrb[0].mxu0 }
 0x483   :  { %v297_v6 = vpop.f32.mrb[1].mxu0  ;;  %269 = vst.msk [vmem:[#allocation10] sm:$0xff] %vm268_vm8, %v264_v5 }
 0x484   :  { %409 = shalt.err (!%p406_p8)
}
 0x485   :  { %s410_s14 = scalar_lea.hbm %s545_s4, 128 }
 0x486   :  { %p411_p9 = scmp.ne.s32.totalorder %s545_s4, %s410_s14  ;;  %p414_p10 = scmp.lt.u32.totalorder %s410_s14, %s545_s4 }
 0x488   :  { %p416_p11 = pnand %p414_p10, %p411_p9 }
 0x48a   :  { %419 = shalt.err (!%p416_p11)
}
 0x48b   :  { %279 = dma.vmem_to_hbm [thread:$0]  %s277_s11, 128, %s545_s4, [#allocation4]  }
 0x48c   :  { %426 = dma.done.wait [#allocation4], 128  }
 0x48d   :  { %427 = vsyncadd [#allocation4], 4294967168 }
 0x48e   :  { %283 = vsyncpa [#allocation3], 1 }
 0x48f   :  { %284 = vsyncpa [#allocation6], 1 }
 0x490   :  { %285 = vsyncpa [#allocation9], 1 }
 0x491   :  { %286 = vsyncpa [#allocation4], 1 }

</bundles_post_ra>
